<compile_context>
chip_gen: v5e
topology: v5e:2x2
jax: 0.10.0
libtpu: 0.0.40
codegen_flags: <defaults>
</compile_context>

<pallas_src>
import functools

import jax
import jax.numpy as jnp
from jax.experimental import pallas as pl
from jax.experimental.pallas import tpu as pltpu

_LANE = 128     # vreg lane width
_MXU_N = 256    # MXU N tile on v6e/v7x (multiple of 128, so also fine on v5e)


def _round_up(x, m):
    return ((x + m - 1) // m) * m


def _pick_spatial_tile(hw_pad, bytes_per_spatial, budget=8 * 1024 * 1024):
    """Largest 128-multiple divisor of hw_pad whose double-buffered block fits."""
    n = hw_pad // _LANE
    best = _LANE
    for d in range(1, n + 1):
        if n % d == 0 and d * _LANE * bytes_per_spatial * 2 <= budget:
            best = d * _LANE
    return best


# ----------------------------------------------------------------------------
# Fused kernel: spatial-sum accumulation -> folded projection -> BatchNorm1d(train)
#   x_ref  : (B, C, T_hw)   bf16  spatial tile of the images (all channels)
#   w_ref  : (C, E_pad)     f32   host-folded GAP + 1x1-conv + Linear weight
#   g_ref  : (1, E_pad)     f32   BN gamma
#   be_ref : (1, E_pad)     f32   BN beta
#   o_ref  : (B, E_pad)     f32   output (written only at the final grid step)
#   acc_ref: (B, C)         f32   VMEM accumulator of per-channel spatial sums
# ----------------------------------------------------------------------------
def _encoder_kernel(x_ref, w_ref, g_ref, be_ref, o_ref, acc_ref, *, eps):
    k = pl.program_id(0)

    @pl.when(k == 0)
    def _init():
        acc_ref[...] = jnp.zeros_like(acc_ref)

    # Per-(batch, channel) spatial partial sum (f32); padded spatial zeros add 0.
    acc_ref[...] += jnp.sum(x_ref[...].astype(jnp.float32), axis=-1)

    @pl.when(k == pl.num_programs(0) - 1)
    def _finalize():
        # Folded pool + 1x1-conv + Linear: one tiny f32 matmul (B,C)@(C,E_pad).
        # Linear bias omitted: training-mode BN subtracts the batch mean, which
        # cancels a per-feature constant bias exactly.
        y = jnp.dot(acc_ref[...], w_ref[...],
                    preferred_element_type=jnp.float32)            # (B, E_pad) f32
        b = y.shape[0]
        mu = jnp.sum(y, axis=0, keepdims=True) * (1.0 / b)
        d = y - mu
        var = jnp.sum(d * d, axis=0, keepdims=True) * (1.0 / b)    # biased var (train)
        scale = g_ref[...] * jax.lax.rsqrt(var + eps)              # gamma*inv_std folded
        o_ref[...] = d * scale + be_ref[...]


# ----------------------------------------------------------------------------
# Wrapper: host-side weight folding + layout plumbing + pallas_call
# ----------------------------------------------------------------------------
def encoder_cnn_forward(images, params, eps=1e-5):
    B, C, H, W = images.shape
    assert B > 1, "training-mode BatchNorm1d needs batch size > 1 (PyTorch errors at B=1)"
    hw = H * W
    embed = params["w_lin"].shape[0]

    hw_pad = _round_up(hw, _LANE)
    e_pad = _round_up(embed, _MXU_N)
    t_hw = _pick_spatial_tile(hw_pad, B * C * 2)   # bf16 bytes per spatial column
    n_tiles = hw_pad // t_hw

    # Images -> (B, C, hw_pad) bf16; zero-padded spatial tail contributes nothing.
    x = images.reshape(B, C, hw).astype(jnp.bfloat16)
    if hw_pad != hw:
        x = jnp.pad(x, ((0, 0), (0, 0), (0, hw_pad - hw)))

    # Host fold (frozen weights, done once): GAP(1/HW) + 1x1 conv + Linear -> (C, E).
    w_comb = jnp.dot(params["w_proj"].T.astype(jnp.float32),
                     params["w_lin"].T.astype(jnp.float32),
                     precision=jax.lax.Precision.HIGHEST) * (1.0 / hw)
    gamma = params["bn_gamma"].astype(jnp.float32).reshape(1, embed)
    beta = params["bn_beta"].astype(jnp.float32).reshape(1, embed)
    if e_pad != embed:
        # Padded weight columns are exactly zero -> d == 0 there -> output stays 0.
        w_comb = jnp.pad(w_comb, ((0, 0), (0, e_pad - embed)))
        gamma = jnp.pad(gamma, ((0, 0), (0, e_pad - embed)))
        beta = jnp.pad(beta, ((0, 0), (0, e_pad - embed)))

    out_pad = pl.pallas_call(
        functools.partial(_encoder_kernel, eps=eps),
        out_shape=jax.ShapeDtypeStruct((B, e_pad), jnp.float32),
        grid_spec=pltpu.PrefetchScalarGridSpec(
            num_scalar_prefetch=0,
            grid=(n_tiles,),
            in_specs=[
                pl.BlockSpec((B, C, t_hw), lambda k: (0, 0, k)),   # streamed image
                pl.BlockSpec((C, e_pad), lambda k: (0, 0)),        # folded weight
                pl.BlockSpec((1, e_pad), lambda k: (0, 0)),        # gamma
                pl.BlockSpec((1, e_pad), lambda k: (0, 0)),        # beta
            ],
            out_specs=pl.BlockSpec((B, e_pad), lambda k: (0, 0)),
            scratch_shapes=[pltpu.VMEM((B, C), jnp.float32)],
        ),
        compiler_params=pltpu.CompilerParams(
            dimension_semantics=("arbitrary",),   # spatial reduction axis
        ),
    )(x, w_comb, gamma, beta)

    return out_pad[:, :embed]


# ----------------------------------------------------------------------------
# Pure-JAX reference (f32, unfused, includes the linear bias) and parameter init
# ----------------------------------------------------------------------------
def _reference_forward(images, params, eps=1e-5):
    B, C = images.shape[:2]
    pooled = images.reshape(B, C, -1).mean(axis=-1)                 # GAP
    feats = pooled @ params["w_proj"].T                             # 1x1 conv
    y = feats @ params["w_lin"].T + params["b_lin"]                 # Linear (with bias)
    mu = y.mean(axis=0, keepdims=True)
    var = ((y - mu) ** 2).mean(axis=0, keepdims=True)               # biased var (BN train)
    return params["bn_gamma"] * (y - mu) / jnp.sqrt(var + eps) + params["bn_beta"]


def init_params(key, c_in, feat_dim, embed_size):
    k1, k2, k3 = jax.random.split(key, 3)
    return {
        # backbone stand-in 1x1 conv weight (out, in) — frozen / pretrained-shaped
        "w_proj": jax.random.normal(k1, (feat_dim, c_in), jnp.float32) * 0.1,
        # nn.Linear(feat_dim, embed_size)
        "w_lin": jax.random.normal(k2, (embed_size, feat_dim), jnp.float32) * 0.05,
        "b_lin": jax.random.normal(k3, (embed_size,), jnp.float32) * 0.05,
        # nn.BatchNorm1d(embed_size): weight=1, bias=0 at init.
        "bn_gamma": jnp.ones((embed_size,), jnp.float32),
        "bn_beta": jnp.zeros((embed_size,), jnp.float32),
    }


if __name__ == "__main__":
    B, C_IN, H, W = 2, 4, 16, 16      # images (NCHW), small stand-in shapes
    FEAT = 64                          # stands in for resnet.fc.in_features (2048)
    EMBED = 32                         # embed_size

    key = jax.random.PRNGKey(0)
    k_img, k_par = jax.random.split(key)
    images = jax.random.normal(k_img, (B, C_IN, H, W), jnp.float32)
    params = init_params(k_par, C_IN, FEAT, EMBED)

    out = jax.block_until_ready(encoder_cnn_forward(images, params))
    ref = _reference_forward(images, params)

    assert out.shape == (B, EMBED)
    assert bool(jnp.all(jnp.isfinite(out)))
    # Only the streamed image is bf16; all reductions/matmul/BN are f32.
    assert bool(jnp.allclose(out, ref, atol=3e-2, rtol=3e-2)), \
        float(jnp.max(jnp.abs(out - ref)))
    print("KERNEL_OK")
</pallas_src>

<mosaic_0001>
module attributes {stable_mosaic.version = 11 : i64} {
  func.func @_encoder_kernel(%arg0: i32, %arg1: memref<2x4x256xbf16, #tpu.memory_space<vmem>>, %arg2: memref<4x256xf32, #tpu.memory_space<vmem>>, %arg3: memref<1x256xf32, #tpu.memory_space<vmem>>, %arg4: memref<1x256xf32, #tpu.memory_space<vmem>>, %arg5: memref<2x256xf32, #tpu.memory_space<vmem>>, %arg6: memref<2x4xf32, #tpu.memory_space<vmem>>) attributes {dimension_semantics = [#tpu.dimension_semantics<arbitrary>], iteration_bounds = array<i64: 1>, scalar_prefetch = 0 : i64, scratch_operands = 1 : i64, tpu.core_type = #tpu.core_type<tc>, window_params = [{transform_indices = @transform_0, window_bounds = array<i64: 2, 4, 256>}, {pipeline_mode = #tpu.pipeline_mode<synchronous>, transform_indices = @transform_1, window_bounds = array<i64: 4, 256>}, {pipeline_mode = #tpu.pipeline_mode<synchronous>, transform_indices = @transform_2, window_bounds = array<i64: 1, 256>}, {pipeline_mode = #tpu.pipeline_mode<synchronous>, transform_indices = @transform_3, window_bounds = array<i64: 1, 256>}, {pipeline_mode = #tpu.pipeline_mode<synchronous>, transform_indices = @transform_4, window_bounds = array<i64: 2, 256>}]} {
    %c0_i32 = arith.constant 0 : i32
    %0 = arith.cmpi eq, %arg0, %c0_i32 : i32
    %1 = arith.extui %0 : i1 to i32
    %c0_i32_0 = arith.constant 0 : i32
    %2 = arith.cmpi ne, %1, %c0_i32_0 : i32
    scf.if %2 {
      %cst_9 = arith.constant 0.000000e+00 : f32
      %12 = vector.broadcast %cst_9 : f32 to vector<2x4xf32>
      %c0_10 = arith.constant 0 : index
      %c0_11 = arith.constant 0 : index
      %13 = vector.load %arg6[%c0_10, %c0_11] : memref<2x4xf32, #tpu.memory_space<vmem>>, vector<2x4xf32>
      tpu.vector_store %arg6[%c0_10, %c0_11], %12 {strides = array<i32>} : memref<2x4xf32, #tpu.memory_space<vmem>>, vector<2x4xf32>,
    } else {
    }
    %c0 = arith.constant 0 : index
    %c0_1 = arith.constant 0 : index
    %3 = vector.load %arg6[%c0, %c0_1] : memref<2x4xf32, #tpu.memory_space<vmem>>, vector<2x4xf32>
    %c0_2 = arith.constant 0 : index
    %c0_3 = arith.constant 0 : index
    %c0_4 = arith.constant 0 : index
    %4 = vector.load %arg1[%c0_2, %c0_3, %c0_4] : memref<2x4x256xbf16, #tpu.memory_space<vmem>>, vector<2x4x256xbf16>
    %5 = arith.extf %4 : vector<2x4x256xbf16> to vector<2x4x256xf32>
    %cst = arith.constant dense<0.000000e+00> : vector<2x4xf32>
    %6 = vector.multi_reduction <add>, %5, %cst [2] : vector<2x4x256xf32> to vector<2x4xf32>
    %7 = arith.addf %3, %6 : vector<2x4xf32>
    %c0_5 = arith.constant 0 : index
    %c0_6 = arith.constant 0 : index
    %8 = vector.load %arg6[%c0_5, %c0_6] : memref<2x4xf32, #tpu.memory_space<vmem>>, vector<2x4xf32>
    tpu.vector_store %arg6[%c0_5, %c0_6], %7 {strides = array<i32>} : memref<2x4xf32, #tpu.memory_space<vmem>>, vector<2x4xf32>,
    %c0_i32_7 = arith.constant 0 : i32
    %9 = arith.cmpi eq, %arg0, %c0_i32_7 : i32
    %10 = arith.extui %9 : i1 to i32
    %c0_i32_8 = arith.constant 0 : i32
    %11 = arith.cmpi ne, %10, %c0_i32_8 : i32
    scf.if %11 {
      %c0_9 = arith.constant 0 : index
      %c0_10 = arith.constant 0 : index
      %12 = vector.load %arg6[%c0_9, %c0_10] : memref<2x4xf32, #tpu.memory_space<vmem>>, vector<2x4xf32>
      %c0_11 = arith.constant 0 : index
      %c0_12 = arith.constant 0 : index
      %13 = vector.load %arg2[%c0_11, %c0_12] : memref<4x256xf32, #tpu.memory_space<vmem>>, vector<4x256xf32>
      %cst_13 = arith.constant dense<0.000000e+00> : vector<2x256xf32>
      %14 = tpu.matmul %12, %13, %cst_13 {dimension_numbers = #tpu.dot_dimension_numbers<[1], [0], [0], [1], [0, 0, 1, 1], [], []>} : vector<2x4xf32>, vector<4x256xf32>, vector<2x256xf32> -> vector<2x256xf32>
      %cst_14 = arith.constant dense<0.000000e+00> : vector<256xf32>
      %15 = vector.multi_reduction <add>, %14, %cst_14 [0] : vector<2x256xf32> to vector<256xf32>
      %16 = vector.shape_cast %15 : vector<256xf32> to vector<1x256xf32>
      %cst_15 = arith.constant 5.000000e-01 : f32
      %17 = vector.broadcast %cst_15 : f32 to vector<1x256xf32>
      %18 = arith.mulf %16, %17 : vector<1x256xf32>
      %19 = vector.broadcast %18 : vector<1x256xf32> to vector<2x256xf32>
      %20 = arith.subf %14, %19 : vector<2x256xf32>
      %21 = arith.mulf %20, %20 : vector<2x256xf32>
      %cst_16 = arith.constant dense<0.000000e+00> : vector<256xf32>
      %22 = vector.multi_reduction <add>, %21, %cst_16 [0] : vector<2x256xf32> to vector<256xf32>
      %23 = vector.shape_cast %22 : vector<256xf32> to vector<1x256xf32>
      %cst_17 = arith.constant 5.000000e-01 : f32
      %24 = vector.broadcast %cst_17 : f32 to vector<1x256xf32>
      %25 = arith.mulf %23, %24 : vector<1x256xf32>
      %c0_18 = arith.constant 0 : index
      %c0_19 = arith.constant 0 : index
      %26 = vector.load %arg3[%c0_18, %c0_19] : memref<1x256xf32, #tpu.memory_space<vmem>>, vector<1x256xf32>
      %cst_20 = arith.constant 9.99999974E-6 : f32
      %27 = vector.broadcast %cst_20 : f32 to vector<1x256xf32>
      %28 = arith.addf %25, %27 : vector<1x256xf32>
      %29 = math.rsqrt %28 : vector<1x256xf32>
      %30 = arith.mulf %26, %29 : vector<1x256xf32>
      %31 = vector.broadcast %30 : vector<1x256xf32> to vector<2x256xf32>
      %32 = arith.mulf %20, %31 : vector<2x256xf32>
      %c0_21 = arith.constant 0 : index
      %c0_22 = arith.constant 0 : index
      %33 = vector.load %arg4[%c0_21, %c0_22] : memref<1x256xf32, #tpu.memory_space<vmem>>, vector<1x256xf32>
      %34 = vector.broadcast %33 : vector<1x256xf32> to vector<2x256xf32>
      %35 = arith.addf %32, %34 : vector<2x256xf32>
      %c0_23 = arith.constant 0 : index
      %c0_24 = arith.constant 0 : index
      %36 = vector.load %arg5[%c0_23, %c0_24] : memref<2x256xf32, #tpu.memory_space<vmem>>, vector<2x256xf32>
      tpu.vector_store %arg5[%c0_23, %c0_24], %35 {strides = array<i32>} : memref<2x256xf32, #tpu.memory_space<vmem>>, vector<2x256xf32>,
    } else {
    }
    return
  }
  func.func @transform_0(%arg0: i32) -> (i32, i32, i32) {
    %c0_i32 = arith.constant 0 : i32
    %c0_i32_0 = arith.constant 0 : i32
    %c0_i32_1 = arith.constant 0 : i32
    return %c0_i32, %c0_i32_0, %arg0 : i32, i32, i32
  }
  func.func @transform_1(%arg0: i32) -> (i32, i32) {
    %c0_i32 = arith.constant 0 : i32
    %c0_i32_0 = arith.constant 0 : i32
    %c0_i32_1 = arith.constant 0 : i32
    return %c0_i32, %c0_i32_0 : i32, i32
  }
  func.func @transform_2(%arg0: i32) -> (i32, i32) {
    %c0_i32 = arith.constant 0 : i32
    %c0_i32_0 = arith.constant 0 : i32
    %c0_i32_1 = arith.constant 0 : i32
    return %c0_i32, %c0_i32_0 : i32, i32
  }
  func.func @transform_3(%arg0: i32) -> (i32, i32) {
    %c0_i32 = arith.constant 0 : i32
    %c0_i32_0 = arith.constant 0 : i32
    %c0_i32_1 = arith.constant 0 : i32
    return %c0_i32, %c0_i32_0 : i32, i32
  }
  func.func @transform_4(%arg0: i32) -> (i32, i32) {
    %c0_i32 = arith.constant 0 : i32
    %c0_i32_0 = arith.constant 0 : i32
    %c0_i32_1 = arith.constant 0 : i32
    return %c0_i32, %c0_i32_0 : i32, i32
  }
}

</mosaic_0001>

<bundles_post_ra>
// kernel: tpu_custom_call.1
= control target key start
LH: loop header
LB: loop body
LE: loop exit
PB: predicated region body
PF: predicated region fallthrough
CT: control target
= control target key end

     0   :  { %9 = vsyncpa [#allocation4], 0  ;;  %s452_s0 = inlined_call_operand.hbm [shape: bf16[2,4,256], index: 0, kind: input, shape index: {}]   ;;  %s453_s1 = inlined_call_operand.hbm [shape: f32[4,256], index: 1, kind: input, shape index: {}]   ;;  %s454_s2 = inlined_call_operand.hbm [shape: f32[1,256], index: 2, kind: input, shape index: {}]   ;;  %s455_s3 = inlined_call_operand.vmem [shape: f32[1,256], index: 3, kind: input, shape index: {}]   ;;  %s456_s4 = inlined_call_operand.hbm [shape: f32[2,256], index: 4, kind: output, shape index: {}]  }
   0x1   :  { %10 = vsyncpa [#allocation7], 0  ;;  %s30_s17 = sshll.u32 %s453_s1, 4  ;;  %s31_s17 = int_to_ptr.hbm [resolvable:$true] %s30_s17 }
   0x2   :  { %11 = vsyncpa [#allocation5], 0  ;;  %s392_s18 = smov [#allocation6]   ;;  %s16_s22 = sshll.u32 %s452_s0, 4  ;;  %s17_s22 = int_to_ptr.hbm [resolvable:$true] %s16_s22 }
   0x3   :  { %s32_s19 = sshll.u32 %s392_s18, 4  ;;  %s393_s23 = smov [#allocation3]   ;;  %s33_s19 = int_to_ptr.vmem [resolvable:$true] %s32_s19 }
   0x4   :  { %35 = dma.hbm_to_vmem [thread:$0]  %s31_s17, 128, %s33_s19, [#allocation7]  }
   0x5   :  { %s18_s24 = sshll.u32 %s393_s23, 4  ;;  %s394_s25 = smov 64   ;;  %s19_s24 = int_to_ptr.vmem [resolvable:$true] %s18_s24 }
   0x6   :  { %s395_s26 = smov 4   ;;  %s41_s1 = sshll.u32 %s454_s2, 4  ;;  %s42_s1 = int_to_ptr.hbm [resolvable:$true] %s41_s1 }
   0x7   :  { %24 = dma.hbm_to_vmem [thread:$0]  %s17_s22, 128, %s19_s24, [#allocation4], %s394_s25, %s394_s25, %s395_s26  }
   0x8   :  { %s396_s29 = smov [#allocation8]  }
   0x9   :  { %s43_s30 = sshll.u32 %s396_s29, 4  ;;  %s44_s30 = int_to_ptr.vmem [resolvable:$true] %s43_s30 }
   0xa   :  { %46 = dma.hbm_to_vmem [thread:$0]  %s42_s1, 32, %s44_s30, [#allocation7]  }
   0xb   :  { %386 = dma.done.wait [#allocation4], 128  }
   0xc   :  { %387 = vsyncadd [#allocation4], 4294967168 }
   0xd   :  { %388 = dma.done.wait [#allocation7], 160  }
   0xe   :  { %389 = vsyncadd [#allocation7], 4294967136  ;;  %v276_v0 = vld [vmem:[#allocation3] sm:$0xff]   ;;  %vm85_vm0 = vcmask 1043456   ;;  %v112_v3 = vld [vmem:[#allocation6] sm:$0xff]  ;;  %vm65_vm1 = vcmask 25600   ;;  %v98_v18 = vlaneseq }
   0xf   :  { %v277_v1 = vunpack.c.l.bf16 %v276_v0  ;;  %v278_v2 = vunpack.c.h.bf16 %v276_v0  ;;  %v397_v14 = vmov 0.0   ;;  %vm102_vm2 = vcmask 1041409   ;;  %s398_s5 = smov [#allocation9]   ;;  %s260_s9 = sshll.u32 %s456_s4, 4  ;;  %s261_s9 = int_to_ptr.hbm [resolvable:$true] %s260_s9 }
  0x10   :  { %66 = vst.msk [vmem:[#allocation2] sm:$0x3] %vm65_vm1, %v397_v14  ;;  %v99_v19 = vand.u32 127, %v98_v18  ;;  %vm117_vm3 = vcmask 31744   ;;  %vm165_vm4 = vcmask 1041408   ;;  %vm228_vm10 = vcmask 1040384  }
  0x11   :  { %74 = vst [vmem:[#allocation1] ss:$2 sm:$0xff] %v277_v1  ;;  %s258_s6 = sshll.u32 %s398_s5, 4  ;;  %s259_s6 = int_to_ptr.vmem [resolvable:$true] %s258_s6 }
  0x12   :  { %78 = vst [vmem:[#allocation1 + $0x10] ss:$2 sm:$0xff] %v278_v2 }
  0x17   :  { %v67_v22 = vld [vmem:[#allocation2] sm:$0x3] }
  0x18   :  { %v75_v4 = vld.sshfl [vmem:[#allocation1] sm:$0xff pattern:$0x75316420]  ;;  %v76_v5 = vld.sshfl [vmem:[#allocation1 + $0x8] sm:$0xff pattern:$0x75316420] }
  0x19   :  { %v86_v6 = vsel %vm85_vm0, %v75_v4, 0.0  ;;  %v87_v7 = vsel %vm85_vm0, %v76_v5, 0.0  ;;  %114 = vst [vmem:[#allocation1] ss:$2 sm:$0xff] %v112_v3 }
  0x1a   :  { %v88_v8 = vadd.f32 %v87_v7, %v86_v6  ;;  %v79_v9 = vld.sshfl [vmem:[#allocation1 + $0x10] sm:$0xff pattern:$0x75316420]  ;;  %v80_v10 = vld.sshfl [vmem:[#allocation1 + $0x18] sm:$0xff pattern:$0x75316420] }
  0x1b   :  { %v91_v11 = vsel %vm85_vm0, %v79_v9, 0.0  ;;  %v92_v12 = vsel %vm85_vm0, %v80_v10, 0.0 }
  0x1c   :  { %89 = vadd.xlane.f32.xlu0 %v88_v8  ;;  %v93_v13 = vadd.f32 %v92_v12, %v91_v11 }
  0x20   :  { %v115_v15 = vld.sshfl [vmem:[#allocation1] sm:$0xff pattern:$0x75316420]  ;;  %v116_v16 = vld.sshfl [vmem:[#allocation1 + $0x8] sm:$0xff pattern:$0x75316420] }
  0x21   :  { %271 = vmatpush.msk.msra.mxu0 %vm85_vm0, %v115_v15  ;;  %273 = vmatpush.msk.msra.mxu1 %vm85_vm0, %v116_v16  ;;  %v202_v16 = vld [vmem:[#allocation8] sm:$0x3] }
  0x24   :  { %94 = vadd.xlane.f32.xlu0 %v93_v13 }
  0x8f   :  { %v90_v17 = vpop.xlane.xlu0 %89 }
  0x90   :  { %v100_v21 = vperm.slane %v90_v17, %v99_v19 }
  0x97   :  { %v95_v20 = vpop.xlane.xlu0 %94 }
  0x98   :  { %v101_v23 = vperm.slane %v95_v20, %v99_v19  ;;  %v239_v20 = vld [vmem:[%s455_s3] sm:$0x3] }
  0x9a   :  { %v103_v24 = vsel %vm102_vm2, %v101_v23, %v100_v21 }
  0x9b   :  { %v105_v25 = vadd.f32 %v103_v24, %v67_v22  ;;  %v242_v24 = vperm.slane %v239_v20, 1 }
  0x9d   :  { %107 = vst.msk [vmem:[#allocation2] sm:$0x3] %vm65_vm1, %v105_v25 }
  0xa4   :  { %v111_v26 = vld [vmem:[#allocation2] sm:$0x3] }
  0xa5   :  { %272 = vmatmul.msk.f32.vlgmr.msra.gmra.mxu0 %vm117_vm3, %v111_v26  ;;  %274 = vmatmul.msk.f32.vlgmr.msra.gmra.mxu1 %vm117_vm3, %v111_v26 }
 0x122   :  { %v142_v27 = vpop.f32.mrf.mxu0  ;;  %v162_v28 = vpop.f32.mrf.mxu1 }
 0x123   :  { %v166_v29 = vsel %vm165_vm4, %v142_v27, 0.0  ;;  %v173_v30 = vsel %vm165_vm4, %v162_v28, 0.0 }
 0x124   :  { %v167_v31 = vrot.slane %v166_v29, 4  ;;  %v174_v32 = vrot.slane %v173_v30, 4 }
 0x126   :  { %v168_v33 = vadd.f32 %v167_v31, %v166_v29  ;;  %v175_v34 = vadd.f32 %v174_v32, %v173_v30 }
 0x128   :  { %v169_v35 = vrot.slane %v168_v33, 2  ;;  %v176_v36 = vrot.slane %v175_v34, 2 }
 0x12a   :  { %v170_v37 = vadd.f32 %v169_v35, %v168_v33  ;;  %v177_v38 = vadd.f32 %v176_v36, %v175_v34 }
 0x12c   :  { %v171_v39 = vrot.slane %v170_v37, 1  ;;  %v178_v40 = vrot.slane %v177_v38, 1 }
 0x12e   :  { %v172_v41 = vadd.f32 %v171_v39, %v170_v37  ;;  %v179_v42 = vadd.f32 %v178_v40, %v177_v38 }
 0x130   :  { %v180_v43 = vmul.f32 0.5, %v172_v41  ;;  %v181_v44 = vmul.f32 0.5, %v179_v42 }
 0x132   :  { %v182_v45 = vsub.f32 %v142_v27, %v180_v43  ;;  %v183_v46 = vsub.f32 %v162_v28, %v181_v44  ;;  %v241_v27 = vperm.slane %v239_v20, 0 }
 0x134   :  { %v184_v47 = vmul.f32 %v182_v45, %v182_v45  ;;  %v185_v48 = vmul.f32 %v183_v46, %v183_v46 }
 0x136   :  { %v186_v49 = vsel %vm165_vm4, %v184_v47, 0.0  ;;  %v193_v50 = vsel %vm165_vm4, %v185_v48, 0.0 }
 0x137   :  { %v187_v51 = vrot.slane %v186_v49, 4  ;;  %v194_v52 = vrot.slane %v193_v50, 4 }
 0x139   :  { %v188_v53 = vadd.f32 %v187_v51, %v186_v49  ;;  %v195_v54 = vadd.f32 %v194_v52, %v193_v50 }
 0x13b   :  { %v189_v55 = vrot.slane %v188_v53, 2  ;;  %v196_v56 = vrot.slane %v195_v54, 2 }
 0x13d   :  { %v190_v57 = vadd.f32 %v189_v55, %v188_v53  ;;  %v197_v58 = vadd.f32 %v196_v56, %v195_v54 }
 0x13f   :  { %v191_v59 = vrot.slane %v190_v57, 1  ;;  %v198_v60 = vrot.slane %v197_v58, 1 }
 0x141   :  { %v192_v61 = vadd.f32 %v191_v59, %v190_v57  ;;  %v199_v62 = vadd.f32 %v198_v60, %v197_v58 }
 0x143   :  { %v200_v63 = vmul.f32 0.5, %v192_v61  ;;  %v201_v0 = vmul.f32 0.5, %v199_v62 }
 0x145   :  { %v203_v1 = vadd.f32 1e-05, %v200_v63  ;;  %v204_v2 = vadd.f32 1e-05, %v201_v0 }
 0x147   :  { %286 = vrsqrt.f32 %v203_v1  ;;  %vm221_vm7 = vweird.f32 %v204_v2  ;;  %vm211_vm9 = vweird.f32 %v203_v1 }
 0x148   :  { %288 = vrsqrt.f32 %v204_v2 }
 0x14d   :  { %v287_v3 = vpop.eup %286 }
 0x14e   :  { %v289_v4 = vpop.eup %288  ;;  %v206_v5 = vmul.f32 %v287_v3, %v203_v1  ;;  %vm212_vm6 = vweird.f32 %v287_v3 }
 0x14f   :  { %v216_v6 = vmul.f32 %v289_v4, %v204_v2  ;;  %vm222_vm5 = vweird.f32 %v289_v4  ;;  %vm213_vm11 = vmor %vm211_vm9, %vm212_vm6 }
 0x150   :  { %v207_v7 = vmul.f32 %v287_v3, %v206_v5  ;;  %vm223_vm8 = vmor %vm221_vm7, %vm222_vm5 }
 0x151   :  { %v217_v8 = vmul.f32 %v289_v4, %v216_v6 }
 0x152   :  { %v208_v9 = vmul.f32 0.5, %v207_v7 }
 0x153   :  { %v218_v10 = vmul.f32 0.5, %v217_v8 }
 0x154   :  { %v209_v11 = vsub.f32 1.5, %v208_v9 }
 0x155   :  { %v219_v12 = vsub.f32 1.5, %v218_v10 }
 0x156   :  { %v210_v13 = vmul.f32 %v287_v3, %v209_v11 }
 0x157   :  { %v220_v14 = vmul.f32 %v289_v4, %v219_v12 }
 0x158   :  { %v214_v18 = vsel %vm213_vm11, %v287_v3, %v210_v13 }
 0x159   :  { %v224_v15 = vsel %vm223_vm8, %v289_v4, %v220_v14 }
 0x15a   :  { %v227_v17 = vrot.slane %v224_v15, 7 }
 0x15c   :  { %v229_v19 = vsel %vm228_vm10, %v214_v18, %v227_v17 }
 0x15d   :  { %v231_v21 = vmul.f32 %v229_v19, %v202_v16 }
 0x15f   :  { %v233_v22 = vperm.slane %v231_v21, 0  ;;  %v234_v23 = vperm.slane %v231_v21, 1 }
 0x161   :  { %v237_v25 = vmul.f32 %v233_v22, %v182_v45  ;;  %v238_v26 = vmul.f32 %v234_v23, %v183_v46 }
 0x163   :  { %v246_v28 = vadd.f32 %v242_v24, %v238_v26  ;;  %v245_v30 = vadd.f32 %v241_v27, %v237_v25 }
 0x165   :  { %v249_v29 = vrot.slane %v246_v28, 6 }
 0x167   :  { %v250_v31 = vsel %vm165_vm4, %v245_v30, %v249_v29 }
 0x168   :  { %252 = vst [vmem:[#allocation9] sm:$0xf] %v250_v31 }
 0x169   :  { %263 = dma.vmem_to_hbm [thread:$0]  %s259_s6, 64, %s261_s9, [#allocation5]  }
 0x16a   :  { %390 = dma.done.wait [#allocation5], 64  }
 0x16b   :  { %391 = vsyncadd [#allocation5], 4294967232 }
 0x16c   :  { %268 = vsyncpa [#allocation4], 1 }
 0x16d   :  { %269 = vsyncpa [#allocation7], 1 }
 0x16e   :  { %270 = vsyncpa [#allocation5], 1 }

</bundles_post_ra>
